<compile_context>
chip_gen: v7x
topology: tpu7x:2x2x1
jax: 0.10.0
libtpu: 0.0.40
codegen_flags: <defaults>
</compile_context>

<pallas_src>
import jax
import jax.numpy as jnp
import numpy as np
from jax.experimental import pallas as pl
from jax.experimental.pallas import tpu as pltpu


# ----------------------------------------------------------------------------
# Pallas kernel: the entire NumNodes forward
# ----------------------------------------------------------------------------
def numnodes_kernel(nmask_ref, w1_ref, b1_ref, w2_ref, b2_ref, out_ref):
    # nmask_ref : (B, N)  node mask, one graph per row (== view(-1, n_nodes))
    # w1_ref    : (1, nf) linear1 weight (in_features = 1, stored as a row)
    # b1_ref    : (1, nf) linear1 bias
    # w2_ref    : (1, nf) linear2 weight row (out_features = 1)
    # b2_ref    : (1, 1)  linear2 bias
    # out_ref   : (B, 1)

    # nodesxmol = sum over nodes / 29
    nodesxmol = jnp.sum(nmask_ref[...], axis=-1, keepdims=True) * (1.0 / 29.0)

    # linear1 (in_features == 1) -> broadcast FMA, not a K=1 MXU matmul.
    pre = nodesxmol * w1_ref[...] + b1_ref[...]            # (B, nf), lane-dense

    # SiLU
    act = pre * (1.0 / (1.0 + jnp.exp(-pre)))              # (B, nf)

    # linear2 (out_features == 1) -> lane-dense multiply + cross-lane reduce.
    out_ref[...] = (jnp.sum(act * w2_ref[...], axis=-1, keepdims=True)
                    + b2_ref[...])                         # (B, 1)


# ----------------------------------------------------------------------------
# Wrapper around pallas_call
# ----------------------------------------------------------------------------
def _full_spec(shape):
    nd = len(shape)
    return pl.BlockSpec(shape, lambda i, _nd=nd: (0,) * _nd)


def numnodes_forward(params, h0, x, edges, edge_attr, node_mask, edge_mask,
                     n_nodes):
    """Mirrors NumNodes.forward. Only node_mask / n_nodes are used."""
    del h0, x, edges, edge_attr, edge_mask  # unused by the module's forward
    BN = node_mask.shape[0]
    N = int(n_nodes)
    B = BN // N
    nf = params['w1'].shape[1]

    nmask = node_mask.reshape(B, N)          # == node_mask.view(-1, n_nodes)

    pred = pl.pallas_call(
        numnodes_kernel,
        out_shape=jax.ShapeDtypeStruct((B, 1), jnp.float32),
        grid=(1,),
        in_specs=[_full_spec((B, N)),
                  _full_spec((1, nf)), _full_spec((1, nf)),
                  _full_spec((1, nf)), _full_spec((1, 1))],
        out_specs=_full_spec((B, 1)),
        compiler_params=pltpu.CompilerParams(
            dimension_semantics=("parallel",)),
    )(nmask, params['w1'], params['b1'], params['w2'], params['b2'])

    return pred[:, 0]                        # .squeeze(1)


# ----------------------------------------------------------------------------
# Deterministic parameter init (matches nn.Linear(1, nf) / nn.Linear(nf, 1))
# ----------------------------------------------------------------------------
def init_params(key, nf):
    k1, k2, k3, k4 = jax.random.split(key, 4)
    bound1 = 1.0                      # 1 / sqrt(in_features=1)
    bound2 = 1.0 / np.sqrt(nf)        # 1 / sqrt(in_features=nf)
    return {
        'w1': jax.random.uniform(k1, (1, nf), jnp.float32, -bound1, bound1),
        'b1': jax.random.uniform(k2, (1, nf), jnp.float32, -bound1, bound1),
        'w2': jax.random.uniform(k3, (1, nf), jnp.float32, -bound2, bound2),
        'b2': jax.random.uniform(k4, (1, 1), jnp.float32, -bound2, bound2),
    }


# ----------------------------------------------------------------------------
# Pure-JAX reference (literal transcription of the torch forward)
# ----------------------------------------------------------------------------
def reference_forward(params, h0, x, edges, edge_attr, node_mask, edge_mask,
                      n_nodes):
    nm = node_mask.reshape(-1, n_nodes)
    nodesxmol = jnp.sum(nm, axis=1, keepdims=True) / 29.0
    h = jax.nn.silu(nodesxmol @ params['w1'] + params['b1'])
    out = h @ params['w2'].T + params['b2']
    return out[:, 0]


# ----------------------------------------------------------------------------
if __name__ == "__main__":
    B, N = 4, 8          # batch (molecules), nodes per graph
    nf = 128             # hidden width of NumNodes (module default)

    key = jax.random.PRNGKey(0)
    kp, kh, kx, ke = jax.random.split(key, 4)
    params = init_params(kp, nf)

    # Inputs mirroring the torch forward signature (most are unused).
    h0 = jax.random.normal(kh, (B * N, 5), jnp.float32)
    x = jax.random.normal(kx, (B * N, 3), jnp.float32)
    edge_attr = jax.random.normal(ke, (B * N * N, 1), jnp.float32)

    # node mask: varying number of valid nodes per graph
    nvalid = [8, 6, 7, 3]
    nmask_np = np.zeros((B, N), np.float32)
    for b in range(B):
        nmask_np[b, :nvalid[b]] = 1.0
    node_mask = jnp.asarray(nmask_np.reshape(B * N, 1))

    em = nmask_np[:, :, None] * nmask_np[:, None, :]
    em = em * (1.0 - np.eye(N, dtype=np.float32))[None]     # drop self edges
    edge_mask = jnp.asarray(em.reshape(B * N * N, 1))

    rows, cols = np.meshgrid(np.arange(N), np.arange(N), indexing='ij')
    edges = [jnp.asarray(rows.reshape(-1), jnp.int32),
             jnp.asarray(cols.reshape(-1), jnp.int32)]

    pred = numnodes_forward(params, h0, x, edges, edge_attr, node_mask,
                            edge_mask, N)
    pred = jax.block_until_ready(pred)

    ref = reference_forward(params, h0, x, edges, edge_attr, node_mask,
                            edge_mask, N)
    np.testing.assert_allclose(np.asarray(pred), np.asarray(ref),
                               rtol=1e-4, atol=1e-4)
    print("KERNEL_OK")
</pallas_src>

<mosaic_0001>
module attributes {stable_mosaic.version = 11 : i64} {
  func.func @numnodes_kernel(%arg0: i32, %arg1: memref<4x8xf32, #tpu.memory_space<vmem>>, %arg2: memref<1x128xf32, #tpu.memory_space<vmem>>, %arg3: memref<1x128xf32, #tpu.memory_space<vmem>>, %arg4: memref<1x128xf32, #tpu.memory_space<vmem>>, %arg5: memref<1x1xf32, #tpu.memory_space<vmem>>, %arg6: memref<4x1xf32, #tpu.memory_space<vmem>>) attributes {dimension_semantics = [#tpu.dimension_semantics<parallel>], iteration_bounds = array<i64: 1>, scalar_prefetch = 0 : i64, scratch_operands = 0 : i64, tpu.core_type = #tpu.core_type<tc>, window_params = [{pipeline_mode = #tpu.pipeline_mode<synchronous>, transform_indices = @transform_0, window_bounds = array<i64: 4, 8>}, {pipeline_mode = #tpu.pipeline_mode<synchronous>, transform_indices = @transform_1, window_bounds = array<i64: 1, 128>}, {pipeline_mode = #tpu.pipeline_mode<synchronous>, transform_indices = @transform_2, window_bounds = array<i64: 1, 128>}, {pipeline_mode = #tpu.pipeline_mode<synchronous>, transform_indices = @transform_3, window_bounds = array<i64: 1, 128>}, {pipeline_mode = #tpu.pipeline_mode<synchronous>, transform_indices = @transform_4, window_bounds = array<i64: 1, 1>}, {pipeline_mode = #tpu.pipeline_mode<synchronous>, transform_indices = @transform_5, window_bounds = array<i64: 4, 1>}]} {
    %c0 = arith.constant 0 : index
    %c0_0 = arith.constant 0 : index
    %0 = vector.load %arg1[%c0, %c0_0] : memref<4x8xf32, #tpu.memory_space<vmem>>, vector<4x8xf32>
    %cst = arith.constant dense<0.000000e+00> : vector<4xf32>
    %1 = vector.multi_reduction <add>, %0, %cst [1] : vector<4x8xf32> to vector<4xf32>
    %2 = vector.shape_cast %1 : vector<4xf32> to vector<4x1xf32>
    %cst_1 = arith.constant 0.0344827585 : f32
    %3 = vector.broadcast %cst_1 : f32 to vector<4x1xf32>
    %4 = arith.mulf %2, %3 : vector<4x1xf32>
    %c0_2 = arith.constant 0 : index
    %c0_3 = arith.constant 0 : index
    %5 = vector.load %arg2[%c0_2, %c0_3] : memref<1x128xf32, #tpu.memory_space<vmem>>, vector<1x128xf32>
    %6 = vector.broadcast %4 : vector<4x1xf32> to vector<4x128xf32>
    %7 = vector.broadcast %5 : vector<1x128xf32> to vector<4x128xf32>
    %8 = arith.mulf %6, %7 : vector<4x128xf32>
    %c0_4 = arith.constant 0 : index
    %c0_5 = arith.constant 0 : index
    %9 = vector.load %arg3[%c0_4, %c0_5] : memref<1x128xf32, #tpu.memory_space<vmem>>, vector<1x128xf32>
    %10 = vector.broadcast %9 : vector<1x128xf32> to vector<4x128xf32>
    %11 = arith.addf %8, %10 : vector<4x128xf32>
    %cst_6 = arith.constant 0.000000e+00 : f32
    %12 = vector.broadcast %cst_6 : f32 to vector<4x128xf32>
    %13 = arith.subf %12, %11 : vector<4x128xf32>
    %14 = math.exp %13 : vector<4x128xf32>
    %cst_7 = arith.constant 1.000000e+00 : f32
    %15 = vector.broadcast %cst_7 : f32 to vector<4x128xf32>
    %16 = arith.addf %15, %14 : vector<4x128xf32>
    %cst_8 = arith.constant 1.000000e+00 : f32
    %17 = vector.broadcast %cst_8 : f32 to vector<4x128xf32>
    %18 = arith.divf %17, %16 : vector<4x128xf32>
    %19 = arith.mulf %11, %18 : vector<4x128xf32>
    %c0_9 = arith.constant 0 : index
    %c0_10 = arith.constant 0 : index
    %20 = vector.load %arg4[%c0_9, %c0_10] : memref<1x128xf32, #tpu.memory_space<vmem>>, vector<1x128xf32>
    %21 = vector.broadcast %20 : vector<1x128xf32> to vector<4x128xf32>
    %22 = arith.mulf %19, %21 : vector<4x128xf32>
    %cst_11 = arith.constant dense<0.000000e+00> : vector<4xf32>
    %23 = vector.multi_reduction <add>, %22, %cst_11 [1] : vector<4x128xf32> to vector<4xf32>
    %24 = vector.shape_cast %23 : vector<4xf32> to vector<4x1xf32>
    %c0_12 = arith.constant 0 : index
    %c0_13 = arith.constant 0 : index
    %25 = vector.load %arg5[%c0_12, %c0_13] : memref<1x1xf32, #tpu.memory_space<vmem>>, vector<1x1xf32>
    %26 = vector.broadcast %25 : vector<1x1xf32> to vector<4x1xf32>
    %27 = arith.addf %24, %26 : vector<4x1xf32>
    %c0_14 = arith.constant 0 : index
    %c0_15 = arith.constant 0 : index
    %28 = vector.load %arg6[%c0_14, %c0_15] : memref<4x1xf32, #tpu.memory_space<vmem>>, vector<4x1xf32>
    tpu.vector_store %arg6[%c0_14, %c0_15], %27 {strides = array<i32>} : memref<4x1xf32, #tpu.memory_space<vmem>>, vector<4x1xf32>,
    return
  }
  func.func @transform_0(%arg0: i32) -> (i32, i32) {
    %c0_i32 = arith.constant 0 : i32
    %c0_i32_0 = arith.constant 0 : i32
    %c0_i32_1 = arith.constant 0 : i32
    return %c0_i32, %c0_i32_0 : i32, i32
  }
  func.func @transform_1(%arg0: i32) -> (i32, i32) {
    %c0_i32 = arith.constant 0 : i32
    %c0_i32_0 = arith.constant 0 : i32
    %c0_i32_1 = arith.constant 0 : i32
    return %c0_i32, %c0_i32_0 : i32, i32
  }
  func.func @transform_2(%arg0: i32) -> (i32, i32) {
    %c0_i32 = arith.constant 0 : i32
    %c0_i32_0 = arith.constant 0 : i32
    %c0_i32_1 = arith.constant 0 : i32
    return %c0_i32, %c0_i32_0 : i32, i32
  }
  func.func @transform_3(%arg0: i32) -> (i32, i32) {
    %c0_i32 = arith.constant 0 : i32
    %c0_i32_0 = arith.constant 0 : i32
    %c0_i32_1 = arith.constant 0 : i32
    return %c0_i32, %c0_i32_0 : i32, i32
  }
  func.func @transform_4(%arg0: i32) -> (i32, i32) {
    %c0_i32 = arith.constant 0 : i32
    %c0_i32_0 = arith.constant 0 : i32
    %c0_i32_1 = arith.constant 0 : i32
    return %c0_i32, %c0_i32_0 : i32, i32
  }
  func.func @transform_5(%arg0: i32) -> (i32, i32) {
    %c0_i32 = arith.constant 0 : i32
    %c0_i32_0 = arith.constant 0 : i32
    %c0_i32_1 = arith.constant 0 : i32
    return %c0_i32, %c0_i32_0 : i32, i32
  }
}

</mosaic_0001>

<bundles_post_ra>
// kernel: tpu_custom_call.1
= control target key start
LH: loop header
LB: loop body
LE: loop exit
PB: predicated region body
PF: predicated region fallthrough
CT: control target
= control target key end

     0   :  { %s181_s0 = inlined_call_operand.hbm [shape: f32[4,8], index: 0, kind: input, shape index: {}]   ;;  %s182_s1 = inlined_call_operand.vmem [shape: f32[1,128], index: 1, kind: input, shape index: {}]   ;;  %s183_s2 = inlined_call_operand.vmem [shape: f32[1,128], index: 2, kind: input, shape index: {}]   ;;  %s184_s3 = inlined_call_operand.vmem [shape: f32[1,128], index: 3, kind: input, shape index: {}]   ;;  %s185_s4 = inlined_call_operand.<no memory space> [shape: f32[1,1], index: 4, kind: input, shape index: {}]   ;;  %s186_s5 = inlined_call_operand.vmem [shape: f32[4,1], index: 5, kind: output, shape index: {}]  }
   0x1   :  { %v10_v0 = vstv %s185_s4 }
   0x2   :  { %11 = vst [vmem:[#allocation2] sm:$0x1] %v10_v0 }
   0x3   :  { %12 = vsyncpa [#allocation4], 0  ;;  %s123_s20 = smov [#allocation3]   ;;  %s99_s24 = scalar_lea.hbm %s181_s0, 64 }
   0x4   :  { %s19_s21 = sshll.u32 %s123_s20, 4  ;;  %p100_p0 = scmp.ne.s32.totalorder %s181_s0, %s99_s24  ;;  %s20_s21 = int_to_ptr.vmem [resolvable:$true] %s19_s21 }
   0x5   :  { %p103_p1 = scmp.lt.u32.totalorder %s99_s24, %s181_s0 }
   0x7   :  { %p105_p2 = pnand %p103_p1, %p100_p0 }
   0x9   :  { %108 = shalt.err (!%p105_p2)
}
   0xa   :  { %s109_s4 = scalar_lea.vmem %s20_s21, 64  ;;  %p114_p4 = scmp.lt.s32.totalorder %s20_s21, %s20_s21 }
   0xb   :  { %p110_p3 = scmp.ne.s32.totalorder %s20_s21, %s109_s4  ;;  %p115_p5 = scmp.lt.s32.totalorder %s109_s4, %s109_s4 }
   0xd   :  { %p116_p6 = por %p115_p5, %p114_p4 }
   0xf   :  { %p117_p7 = pnand %p116_p6, %p110_p3 }
  0x11   :  { %120 = shalt.err (!%p117_p7)
}
  0x12   :  { %22 = dma.hbm_to_vmem [thread:$0]  %s181_s0, 64, %s20_s21, [#allocation4]  }
  0x13   :  { %121 = dma.done.wait [#allocation4], 64  }
  0x14   :  { %122 = vsyncadd [#allocation4], 4294967232  ;;  %vm35_vm0 = vcmask 60416   ;;  %v34_v1 = vld [vmem:[#allocation3] sm:$0xf]  ;;  %vm71_vm1 = vcmask 1043456  }
  0x15   :  { %v36_v2 = vsel %vm35_vm0, %v34_v1, 0.0  ;;  %v90_v3 = vld [vmem:[%s182_s1] ss:$0 sm:$0xff]  ;;  %vm83_vm2 = vcmask 3072  }
  0x16   :  { %37 = vadd.xlane.f32.xlu0 %v36_v2  ;;  %v91_v6 = vld [vmem:[%s183_s2] ss:$0 sm:$0xff] }
  0x17   :  { %v92_v14 = vld [vmem:[%s184_s3] ss:$0 sm:$0xff] }
  0x18   :  { %v93_v18 = vld [vmem:[#allocation2] ss:$0 sm:$0xff] }
  0xa3   :  { %v38_v4 = vpop.xlane.xlu0 %37 }
  0xa4   :  { %v39_v5 = vmul.f32 0.03448276, %v38_v4 }
  0xa6   :  { %v47_v7 = vmul.f32 %v90_v3, %v39_v5 }
  0xa8   :  { %v55_v8 = vadd.f32 %v91_v6, %v47_v7 }
  0xaa   :  { %v56_v9 = vsub.f32 0.0, %v55_v8 }
  0xac   :  { %v57_v10 = vmul.f32 1.442695, %v56_v9 }
  0xae   :  { %95 = vpow2.f32 %v57_v10 }
  0xb8   :  { %v96_v11 = vpop.eup %95 }
  0xb9   :  { %v59_v12 = vadd.f32 1.0, %v96_v11 }
  0xbb   :  { %97 = vrcp.f32 %v59_v12 }
  0xc5   :  { %v98_v13 = vpop.eup %97 }
  0xc6   :  { %v62_v15 = vmul.f32 %v98_v13, %v55_v8 }
  0xc8   :  { %v70_v16 = vmul.f32 %v92_v14, %v62_v15 }
  0xca   :  { %v72_v17 = vsel %vm71_vm1, %v70_v16, 0.0 }
  0xcb   :  { %73 = vadd.xlane.f32.xlu0 %v72_v17 }
 0x158   :  { %v74_v19 = vpop.xlane.xlu0 %73 }
 0x159   :  { %v82_v20 = vadd.f32 %v93_v18, %v74_v19 }
 0x15b   :  { %84 = vst.msk [vmem:[%s186_s5] sm:$0xf] %vm83_vm2, %v82_v20 }
 0x15c   :  { %89 = vsyncpa [#allocation4], 1 }

</bundles_post_ra>
